<compile_context>
chip_gen: v7x
topology: tpu7x:2x2x1
jax: 0.10.0
libtpu: 0.0.40
codegen_flags: <defaults>
</compile_context>

<pallas_src>
import jax
import jax.numpy as jnp
from jax.experimental import pallas as pl
from jax.experimental.pallas import tpu as pltpu

NUM_FREQS = 5  # K: number of Fourier frequencies in the basis


def _round_up(x, m):
    return (x + m - 1) // m * m


def _kan_fourier_kernel(x_ref, w_ref, b_ref, fa_ref, fb_ref, o_ref):
    # x_ref : (TB, Din)   w_ref : (Din, TD)   b_ref : (1, TD)
    # fa_ref: (K, TD)     fb_ref: (K, TD)     o_ref : (TB, TD)
    din = x_ref.shape[1]
    n_freq = fa_ref.shape[0]

    x = x_ref[...]
    w = w_ref[...]
    bias = b_ref[...]
    if bias.dtype != jnp.float32:
        bias = bias.astype(jnp.float32)

    if din <= 8:
        # Tiny contraction: VPU broadcast-FMA. Skips the MXU (a (TB, <=8) x
        # (<=8, TD) matmul uses <7% of the MXU depth) and its result-FIFO pop.
        xf = x.astype(jnp.float32)
        wf = w.astype(jnp.float32)
        x_prime = xf[:, 0:1] * wf[0:1, :] + bias
        for d in range(1, din):
            x_prime = x_prime + xf[:, d:d + 1] * wf[d:d + 1, :]
    else:
        # MXU path; weights are stored bf16 for Din >= 128 (kan_prepare_params).
        xm = x.astype(jnp.bfloat16) if w.dtype == jnp.bfloat16 else x.astype(jnp.float32)
        x_prime = jnp.dot(xm, w, preferred_element_type=jnp.float32) + bias

    # Hoist coefficient loads (and casts, if any) out of the harmonic loop.
    fa = fa_ref[...]
    fb = fb_ref[...]
    if fa.dtype != jnp.float32:
        fa = fa.astype(jnp.float32)
    if fb.dtype != jnp.float32:
        fb = fb.astype(jnp.float32)

    # 2 EUP transcendentals per element; higher harmonics via the Chebyshev
    # three-term recurrence (2 mul + 2 sub per harmonic on the VALU):
    #   cos((k+1)x) = 2 cos(x) cos(kx) - cos((k-1)x)
    #   sin((k+1)x) = 2 cos(x) sin(kx) - sin((k-1)x)
    c1 = jnp.cos(x_prime)
    s1 = jnp.sin(x_prime)
    two_c1 = c1 + c1
    ck_m1 = jnp.ones_like(c1)      # cos(0 * x)
    sk_m1 = jnp.zeros_like(s1)     # sin(0 * x)
    ck, sk = c1, s1
    acc = fa[0:1, :] * ck + fb[0:1, :] * sk
    for k in range(1, n_freq):     # K is small & static -> fully unrolled
        ck, ck_m1 = two_c1 * ck - ck_m1, ck
        sk, sk_m1 = two_c1 * sk - sk_m1, sk
        acc = acc + fa[k:k + 1, :] * ck + fb[k:k + 1, :] * sk

    o_ref[...] = acc.astype(o_ref.dtype)


def _vmem_budget_bytes():
    """~85% of physical per-core VMEM (headroom for compiler scratch).
    -> ~54 MiB on v7x (64 MiB), ~109 MiB on v5e/v6e (128 MiB)."""
    try:
        cap = int(pltpu.get_tpu_info().vmem_capacity_bytes)
    except Exception:
        cap = 64 * 1024 * 1024
    return max(int(cap * 0.85), 16 * 1024 * 1024)


def kan_prepare_params(alpha_weights, alpha_bias, fourier_a, fourier_b,
                       *, dout_tile=1024):
    """Pad/cast the learnable parameters ONCE (not on every forward call).

    Pads out_features up to a lane-dense multiple of 128 (and of the Dout tile
    size); zero-padded columns produce zeros that are sliced away in forward.
    Weights are stored bf16 when Din is large enough for the MXU to matter.
    """
    din, dout = alpha_weights.shape
    n_freq = fourier_a.shape[0]

    dout_p = _round_up(dout, 128)
    td = min(_round_up(min(dout_tile, dout_p), 128), dout_p)
    dout_p = _round_up(dout_p, td)
    pad = dout_p - dout

    w_dtype = jnp.bfloat16 if din >= 128 else jnp.float32
    w_p = jnp.pad(alpha_weights.astype(w_dtype), ((0, 0), (0, pad)))
    b_p = jnp.pad(alpha_bias.astype(jnp.float32).reshape(1, dout),
                  ((0, 0), (0, pad)))
    fa_p = jnp.pad(fourier_a.astype(jnp.float32), ((0, 0), (0, pad)))
    fb_p = jnp.pad(fourier_b.astype(jnp.float32), ((0, 0), (0, pad)))

    return {"w": w_p, "b": b_p, "fa": fa_p, "fb": fb_p,
            "out_features": dout, "td": td, "n_freq": n_freq}


def _choose_batch_tile(batch, din, td, n_freq, batch_tile, vmem_budget,
                       param_buffers):
    # Resident parameter footprint (per pipeline buffer).
    param_bytes = 4 * param_buffers * (din * td + td + 2 * n_freq * td)
    if param_bytes >= vmem_budget:
        raise ValueError(
            "Parameter tile does not fit in VMEM; reduce dout_tile in "
            "kan_prepare_params (Din * Dout_tile too large).")
    # Per batch row: double-buffered x/out tiles + ~6 live f32 intermediates.
    per_row = 4 * (2 * din + 2 * td + 6 * td)
    avail = max(vmem_budget - param_bytes, per_row * 8)
    tb_cap = max((avail // per_row) // 8 * 8, 8)
    tb = max(min(batch_tile, tb_cap), 8)
    # Minimize batch padding: shrink the tile to just cover B with the same
    # number of grid steps (avoids up to a full tile of garbage rows).
    n_tiles = int(pl.cdiv(batch, tb))
    tb = min(tb, _round_up(int(pl.cdiv(batch, n_tiles)), 8))
    return max(tb, 8), n_tiles


def kan_layer_forward(x, params, *, batch_tile=1024, out_dtype=None):
    """Pallas-backed KANLayer forward.  x: (B, Din) -> (B, out_features).

    `params` comes from kan_prepare_params (padding hoisted out of this path).
    On v5e, pass out_dtype=jnp.bfloat16 to halve output writeback bytes if the
    consumer allows it (all in-kernel math stays f32).
    """
    batch, din = x.shape
    dout = params["out_features"]
    td = params["td"]
    n_freq = params["n_freq"]
    w_p, b_p, fa_p, fb_p = params["w"], params["b"], params["fa"], params["fb"]
    dout_p = w_p.shape[1]
    n_d = dout_p // td
    out_dtype = out_dtype if out_dtype is not None else x.dtype

    vmem_budget = _vmem_budget_bytes()
    tb, n_b = _choose_batch_tile(batch, din, td, n_freq, batch_tile,
                                 vmem_budget, param_buffers=1)
    b_pad = n_b * tb
    x_p = jnp.pad(x, ((0, b_pad - batch), (0, 0))) if b_pad != batch else x

    # Batch is the fastest-varying grid axis so the parameter tiles (W, bias,
    # fa, fb) stay resident across it; both axes are "parallel" so v7x's two
    # TensorCores can split either the batch tiles or the Dout tiles.
    grid = (n_d, n_b)

    def _run(use_param_buffered):
        def pspec(shape, imap):
            if use_param_buffered:
                return pl.BlockSpec(shape, imap, pipeline_mode=pl.Buffered(1))
            return pl.BlockSpec(shape, imap)

        return pl.pallas_call(
            _kan_fourier_kernel,
            out_shape=jax.ShapeDtypeStruct((b_pad, dout_p), out_dtype),
            grid_spec=pltpu.PrefetchScalarGridSpec(
                num_scalar_prefetch=0,
                grid=grid,
                in_specs=[
                    pl.BlockSpec((tb, din), lambda j, i: (i, 0)),   # x tile
                    pspec((din, td), lambda j, i: (0, j)),          # W
                    pspec((1, td), lambda j, i: (0, j)),            # bias
                    pspec((n_freq, td), lambda j, i: (0, j)),       # fourier a
                    pspec((n_freq, td), lambda j, i: (0, j)),       # fourier b
                ],
                out_specs=pl.BlockSpec((tb, td), lambda j, i: (i, j)),
            ),
            compiler_params=pltpu.CompilerParams(
                dimension_semantics=("parallel", "parallel"),
                vmem_limit_bytes=int(vmem_budget),
            ),
        )(x_p, w_p, b_p, fa_p, fb_p)

    try:
        out = _run(True)
    except Exception:
        # pl.Buffered(1) rejected by this jax version/backend -> fall back to
        # default double-buffered parameter specs (identical results).
        out = _run(False)

    return out[:batch, :dout]


def kan_layer_reference(x, alpha_weights, alpha_bias, fourier_a, fourier_b):
    """Pure-JAX reference for correctness checking."""
    x_prime = x @ alpha_weights + alpha_bias[None, :]
    k = jnp.arange(1, fourier_a.shape[0] + 1, dtype=jnp.float32)
    angles = k[None, :, None] * x_prime[:, None, :]            # (B, K, Dout)
    return (fourier_a[None] * jnp.cos(angles)
            + fourier_b[None] * jnp.sin(angles)).sum(axis=1)   # (B, Dout)


if __name__ == "__main__":
    # Small deterministic setup consistent with the module: time-encoding
    # use-case -> in_features = 1 (scalar timestamp per sample).
    batch, in_features, out_features = 8, 1, 32

    key = jax.random.PRNGKey(0)
    k_x, k_w, k_a, k_b = jax.random.split(key, 4)

    x = jax.random.normal(k_x, (batch, in_features), dtype=jnp.float32)

    # Parameter init mirroring __init__: randn * 0.1 weights, zero bias.
    alpha_weights = 0.1 * jax.random.normal(
        k_w, (in_features, out_features), dtype=jnp.float32)
    alpha_bias = jnp.zeros((out_features,), dtype=jnp.float32)

    # Deterministic Fourier basis coefficients (learnable params of the basis).
    scale = 1.0 / jnp.sqrt(jnp.float32(NUM_FREQS))
    fourier_a = scale * jax.random.normal(
        k_a, (NUM_FREQS, out_features), dtype=jnp.float32)
    fourier_b = scale * jax.random.normal(
        k_b, (NUM_FREQS, out_features), dtype=jnp.float32)

    # Pad/cast parameters once (hoisted out of the per-call path).
    params = kan_prepare_params(alpha_weights, alpha_bias, fourier_a, fourier_b)

    out = kan_layer_forward(x, params)
    out = jax.block_until_ready(out)

    ref = kan_layer_reference(x, alpha_weights, alpha_bias, fourier_a, fourier_b)
    assert out.shape == (batch, out_features)
    assert jnp.allclose(out, ref, atol=2e-5, rtol=2e-5), "mismatch vs reference"

    print("KERNEL_OK")
</pallas_src>

<mosaic_0001>
module attributes {stable_mosaic.version = 11 : i64} {
  func.func @_kan_fourier_kernel(%arg0: i32, %arg1: i32, %arg2: memref<8x1xf32, #tpu.memory_space<vmem>>, %arg3: memref<1x128xf32, #tpu.memory_space<vmem>>, %arg4: memref<1x128xf32, #tpu.memory_space<vmem>>, %arg5: memref<5x128xf32, #tpu.memory_space<vmem>>, %arg6: memref<5x128xf32, #tpu.memory_space<vmem>>, %arg7: memref<8x128xf32, #tpu.memory_space<vmem>>) attributes {dimension_semantics = [#tpu.dimension_semantics<parallel>, #tpu.dimension_semantics<parallel>], iteration_bounds = array<i64: 1, 1>, scalar_prefetch = 0 : i64, scratch_operands = 0 : i64, tpu.core_type = #tpu.core_type<tc>, window_params = [{transform_indices = @transform_0, window_bounds = array<i64: 8, 1>}, {pipeline_mode = #tpu.pipeline_mode<synchronous>, transform_indices = @transform_1, window_bounds = array<i64: 1, 128>}, {pipeline_mode = #tpu.pipeline_mode<synchronous>, transform_indices = @transform_2, window_bounds = array<i64: 1, 128>}, {pipeline_mode = #tpu.pipeline_mode<synchronous>, transform_indices = @transform_3, window_bounds = array<i64: 5, 128>}, {pipeline_mode = #tpu.pipeline_mode<synchronous>, transform_indices = @transform_4, window_bounds = array<i64: 5, 128>}, {transform_indices = @transform_5, window_bounds = array<i64: 8, 128>}]} {
    %c0 = arith.constant 0 : index
    %c0_0 = arith.constant 0 : index
    %0 = vector.load %arg2[%c0, %c0_0] : memref<8x1xf32, #tpu.memory_space<vmem>>, vector<8x1xf32>
    %c0_1 = arith.constant 0 : index
    %c0_2 = arith.constant 0 : index
    %1 = vector.load %arg3[%c0_1, %c0_2] : memref<1x128xf32, #tpu.memory_space<vmem>>, vector<1x128xf32>
    %c0_3 = arith.constant 0 : index
    %c0_4 = arith.constant 0 : index
    %2 = vector.load %arg4[%c0_3, %c0_4] : memref<1x128xf32, #tpu.memory_space<vmem>>, vector<1x128xf32>
    %3 = vector.broadcast %0 : vector<8x1xf32> to vector<8x128xf32>
    %4 = vector.broadcast %1 : vector<1x128xf32> to vector<8x128xf32>
    %5 = arith.mulf %3, %4 : vector<8x128xf32>
    %6 = vector.broadcast %2 : vector<1x128xf32> to vector<8x128xf32>
    %7 = arith.addf %5, %6 : vector<8x128xf32>
    %c0_5 = arith.constant 0 : index
    %c0_6 = arith.constant 0 : index
    %8 = vector.load %arg5[%c0_5, %c0_6] : memref<5x128xf32, #tpu.memory_space<vmem>>, vector<5x128xf32>
    %c0_7 = arith.constant 0 : index
    %c0_8 = arith.constant 0 : index
    %9 = vector.load %arg6[%c0_7, %c0_8] : memref<5x128xf32, #tpu.memory_space<vmem>>, vector<5x128xf32>
    %10 = math.cos %7 : vector<8x128xf32>
    %11 = math.sin %7 : vector<8x128xf32>
    %12 = arith.addf %10, %10 : vector<8x128xf32>
    %cst = arith.constant 1.000000e+00 : f32
    %13 = vector.broadcast %cst : f32 to vector<8x128xf32>
    %cst_9 = arith.constant 0.000000e+00 : f32
    %14 = vector.broadcast %cst_9 : f32 to vector<8x128xf32>
    %15 = vector.extract_strided_slice %8 {offsets = [0, 0], sizes = [1, 128], strides = [1, 1]} : vector<5x128xf32> to vector<1x128xf32>
    %16 = vector.broadcast %15 : vector<1x128xf32> to vector<8x128xf32>
    %17 = arith.mulf %16, %10 : vector<8x128xf32>
    %18 = vector.extract_strided_slice %9 {offsets = [0, 0], sizes = [1, 128], strides = [1, 1]} : vector<5x128xf32> to vector<1x128xf32>
    %19 = vector.broadcast %18 : vector<1x128xf32> to vector<8x128xf32>
    %20 = arith.mulf %19, %11 : vector<8x128xf32>
    %21 = arith.addf %17, %20 : vector<8x128xf32>
    %22 = arith.mulf %12, %10 : vector<8x128xf32>
    %23 = arith.subf %22, %13 : vector<8x128xf32>
    %24 = arith.mulf %12, %11 : vector<8x128xf32>
    %25 = arith.subf %24, %14 : vector<8x128xf32>
    %26 = vector.extract_strided_slice %8 {offsets = [1, 0], sizes = [1, 128], strides = [1, 1]} : vector<5x128xf32> to vector<1x128xf32>
    %27 = vector.broadcast %26 : vector<1x128xf32> to vector<8x128xf32>
    %28 = arith.mulf %27, %23 : vector<8x128xf32>
    %29 = arith.addf %21, %28 : vector<8x128xf32>
    %30 = vector.extract_strided_slice %9 {offsets = [1, 0], sizes = [1, 128], strides = [1, 1]} : vector<5x128xf32> to vector<1x128xf32>
    %31 = vector.broadcast %30 : vector<1x128xf32> to vector<8x128xf32>
    %32 = arith.mulf %31, %25 : vector<8x128xf32>
    %33 = arith.addf %29, %32 : vector<8x128xf32>
    %34 = arith.mulf %12, %23 : vector<8x128xf32>
    %35 = arith.subf %34, %10 : vector<8x128xf32>
    %36 = arith.mulf %12, %25 : vector<8x128xf32>
    %37 = arith.subf %36, %11 : vector<8x128xf32>
    %38 = vector.extract_strided_slice %8 {offsets = [2, 0], sizes = [1, 128], strides = [1, 1]} : vector<5x128xf32> to vector<1x128xf32>
    %39 = vector.broadcast %38 : vector<1x128xf32> to vector<8x128xf32>
    %40 = arith.mulf %39, %35 : vector<8x128xf32>
    %41 = arith.addf %33, %40 : vector<8x128xf32>
    %42 = vector.extract_strided_slice %9 {offsets = [2, 0], sizes = [1, 128], strides = [1, 1]} : vector<5x128xf32> to vector<1x128xf32>
    %43 = vector.broadcast %42 : vector<1x128xf32> to vector<8x128xf32>
    %44 = arith.mulf %43, %37 : vector<8x128xf32>
    %45 = arith.addf %41, %44 : vector<8x128xf32>
    %46 = arith.mulf %12, %35 : vector<8x128xf32>
    %47 = arith.subf %46, %23 : vector<8x128xf32>
    %48 = arith.mulf %12, %37 : vector<8x128xf32>
    %49 = arith.subf %48, %25 : vector<8x128xf32>
    %50 = vector.extract_strided_slice %8 {offsets = [3, 0], sizes = [1, 128], strides = [1, 1]} : vector<5x128xf32> to vector<1x128xf32>
    %51 = vector.broadcast %50 : vector<1x128xf32> to vector<8x128xf32>
    %52 = arith.mulf %51, %47 : vector<8x128xf32>
    %53 = arith.addf %45, %52 : vector<8x128xf32>
    %54 = vector.extract_strided_slice %9 {offsets = [3, 0], sizes = [1, 128], strides = [1, 1]} : vector<5x128xf32> to vector<1x128xf32>
    %55 = vector.broadcast %54 : vector<1x128xf32> to vector<8x128xf32>
    %56 = arith.mulf %55, %49 : vector<8x128xf32>
    %57 = arith.addf %53, %56 : vector<8x128xf32>
    %58 = arith.mulf %12, %47 : vector<8x128xf32>
    %59 = arith.subf %58, %35 : vector<8x128xf32>
    %60 = arith.mulf %12, %49 : vector<8x128xf32>
    %61 = arith.subf %60, %37 : vector<8x128xf32>
    %62 = vector.extract_strided_slice %8 {offsets = [4, 0], sizes = [1, 128], strides = [1, 1]} : vector<5x128xf32> to vector<1x128xf32>
    %63 = vector.broadcast %62 : vector<1x128xf32> to vector<8x128xf32>
    %64 = arith.mulf %63, %59 : vector<8x128xf32>
    %65 = arith.addf %57, %64 : vector<8x128xf32>
    %66 = vector.extract_strided_slice %9 {offsets = [4, 0], sizes = [1, 128], strides = [1, 1]} : vector<5x128xf32> to vector<1x128xf32>
    %67 = vector.broadcast %66 : vector<1x128xf32> to vector<8x128xf32>
    %68 = arith.mulf %67, %61 : vector<8x128xf32>
    %69 = arith.addf %65, %68 : vector<8x128xf32>
    %c0_10 = arith.constant 0 : index
    %c0_11 = arith.constant 0 : index
    %70 = vector.load %arg7[%c0_10, %c0_11] : memref<8x128xf32, #tpu.memory_space<vmem>>, vector<8x128xf32>
    tpu.vector_store %arg7[%c0_10, %c0_11], %69 {strides = array<i32>} : memref<8x128xf32, #tpu.memory_space<vmem>>, vector<8x128xf32>,
    return
  }
  func.func @transform_0(%arg0: i32, %arg1: i32) -> (i32, i32) {
    %c0_i32 = arith.constant 0 : i32
    %c0_i32_0 = arith.constant 0 : i32
    return %arg1, %c0_i32 : i32, i32
  }
  func.func @transform_1(%arg0: i32, %arg1: i32) -> (i32, i32) {
    %c0_i32 = arith.constant 0 : i32
    %c0_i32_0 = arith.constant 0 : i32
    return %c0_i32, %arg0 : i32, i32
  }
  func.func @transform_2(%arg0: i32, %arg1: i32) -> (i32, i32) {
    %c0_i32 = arith.constant 0 : i32
    %c0_i32_0 = arith.constant 0 : i32
    return %c0_i32, %arg0 : i32, i32
  }
  func.func @transform_3(%arg0: i32, %arg1: i32) -> (i32, i32) {
    %c0_i32 = arith.constant 0 : i32
    %c0_i32_0 = arith.constant 0 : i32
    return %c0_i32, %arg0 : i32, i32
  }
  func.func @transform_4(%arg0: i32, %arg1: i32) -> (i32, i32) {
    %c0_i32 = arith.constant 0 : i32
    %c0_i32_0 = arith.constant 0 : i32
    return %c0_i32, %arg0 : i32, i32
  }
  func.func @transform_5(%arg0: i32, %arg1: i32) -> (i32, i32) {
    %c0_i32 = arith.constant 0 : i32
    return %arg1, %arg0 : i32, i32
  }
}

module attributes {stable_mosaic.version = 11 : i64} {
  func.func @_kan_fourier_kernel(%arg0: i32, %arg1: i32, %arg2: memref<8x1xf32, #tpu.memory_space<vmem>>, %arg3: memref<1x128xf32, #tpu.memory_space<vmem>>, %arg4: memref<1x128xf32, #tpu.memory_space<vmem>>, %arg5: memref<5x128xf32, #tpu.memory_space<vmem>>, %arg6: memref<5x128xf32, #tpu.memory_space<vmem>>, %arg7: memref<8x128xf32, #tpu.memory_space<vmem>>) attributes {dimension_semantics = [#tpu.dimension_semantics<parallel>, #tpu.dimension_semantics<parallel>], iteration_bounds = array<i64: 1, 1>, scalar_prefetch = 0 : i64, scratch_operands = 0 : i64, tpu.core_type = #tpu.core_type<tc>, window_params = [{transform_indices = @transform_0, window_bounds = array<i64: 8, 1>}, {transform_indices = @transform_1, window_bounds = array<i64: 1, 128>}, {transform_indices = @transform_2, window_bounds = array<i64: 1, 128>}, {transform_indices = @transform_3, window_bounds = array<i64: 5, 128>}, {transform_indices = @transform_4, window_bounds = array<i64: 5, 128>}, {transform_indices = @transform_5, window_bounds = array<i64: 8, 128>}]} {
    %c0 = arith.constant 0 : index
    %c0_0 = arith.constant 0 : index
    %0 = vector.load %arg2[%c0, %c0_0] : memref<8x1xf32, #tpu.memory_space<vmem>>, vector<8x1xf32>
    %c0_1 = arith.constant 0 : index
    %c0_2 = arith.constant 0 : index
    %1 = vector.load %arg3[%c0_1, %c0_2] : memref<1x128xf32, #tpu.memory_space<vmem>>, vector<1x128xf32>
    %c0_3 = arith.constant 0 : index
    %c0_4 = arith.constant 0 : index
    %2 = vector.load %arg4[%c0_3, %c0_4] : memref<1x128xf32, #tpu.memory_space<vmem>>, vector<1x128xf32>
    %3 = vector.broadcast %0 : vector<8x1xf32> to vector<8x128xf32>
    %4 = vector.broadcast %1 : vector<1x128xf32> to vector<8x128xf32>
    %5 = arith.mulf %3, %4 : vector<8x128xf32>
    %6 = vector.broadcast %2 : vector<1x128xf32> to vector<8x128xf32>
    %7 = arith.addf %5, %6 : vector<8x128xf32>
    %c0_5 = arith.constant 0 : index
    %c0_6 = arith.constant 0 : index
    %8 = vector.load %arg5[%c0_5, %c0_6] : memref<5x128xf32, #tpu.memory_space<vmem>>, vector<5x128xf32>
    %c0_7 = arith.constant 0 : index
    %c0_8 = arith.constant 0 : index
    %9 = vector.load %arg6[%c0_7, %c0_8] : memref<5x128xf32, #tpu.memory_space<vmem>>, vector<5x128xf32>
    %10 = math.cos %7 : vector<8x128xf32>
    %11 = math.sin %7 : vector<8x128xf32>
    %12 = arith.addf %10, %10 : vector<8x128xf32>
    %cst = arith.constant 1.000000e+00 : f32
    %13 = vector.broadcast %cst : f32 to vector<8x128xf32>
    %cst_9 = arith.constant 0.000000e+00 : f32
    %14 = vector.broadcast %cst_9 : f32 to vector<8x128xf32>
    %15 = vector.extract_strided_slice %8 {offsets = [0, 0], sizes = [1, 128], strides = [1, 1]} : vector<5x128xf32> to vector<1x128xf32>
    %16 = vector.broadcast %15 : vector<1x128xf32> to vector<8x128xf32>
    %17 = arith.mulf %16, %10 : vector<8x128xf32>
    %18 = vector.extract_strided_slice %9 {offsets = [0, 0], sizes = [1, 128], strides = [1, 1]} : vector<5x128xf32> to vector<1x128xf32>
    %19 = vector.broadcast %18 : vector<1x128xf32> to vector<8x128xf32>
    %20 = arith.mulf %19, %11 : vector<8x128xf32>
    %21 = arith.addf %17, %20 : vector<8x128xf32>
    %22 = arith.mulf %12, %10 : vector<8x128xf32>
    %23 = arith.subf %22, %13 : vector<8x128xf32>
    %24 = arith.mulf %12, %11 : vector<8x128xf32>
    %25 = arith.subf %24, %14 : vector<8x128xf32>
    %26 = vector.extract_strided_slice %8 {offsets = [1, 0], sizes = [1, 128], strides = [1, 1]} : vector<5x128xf32> to vector<1x128xf32>
    %27 = vector.broadcast %26 : vector<1x128xf32> to vector<8x128xf32>
    %28 = arith.mulf %27, %23 : vector<8x128xf32>
    %29 = arith.addf %21, %28 : vector<8x128xf32>
    %30 = vector.extract_strided_slice %9 {offsets = [1, 0], sizes = [1, 128], strides = [1, 1]} : vector<5x128xf32> to vector<1x128xf32>
    %31 = vector.broadcast %30 : vector<1x128xf32> to vector<8x128xf32>
    %32 = arith.mulf %31, %25 : vector<8x128xf32>
    %33 = arith.addf %29, %32 : vector<8x128xf32>
    %34 = arith.mulf %12, %23 : vector<8x128xf32>
    %35 = arith.subf %34, %10 : vector<8x128xf32>
    %36 = arith.mulf %12, %25 : vector<8x128xf32>
    %37 = arith.subf %36, %11 : vector<8x128xf32>
    %38 = vector.extract_strided_slice %8 {offsets = [2, 0], sizes = [1, 128], strides = [1, 1]} : vector<5x128xf32> to vector<1x128xf32>
    %39 = vector.broadcast %38 : vector<1x128xf32> to vector<8x128xf32>
    %40 = arith.mulf %39, %35 : vector<8x128xf32>
    %41 = arith.addf %33, %40 : vector<8x128xf32>
    %42 = vector.extract_strided_slice %9 {offsets = [2, 0], sizes = [1, 128], strides = [1, 1]} : vector<5x128xf32> to vector<1x128xf32>
    %43 = vector.broadcast %42 : vector<1x128xf32> to vector<8x128xf32>
    %44 = arith.mulf %43, %37 : vector<8x128xf32>
    %45 = arith.addf %41, %44 : vector<8x128xf32>
    %46 = arith.mulf %12, %35 : vector<8x128xf32>
    %47 = arith.subf %46, %23 : vector<8x128xf32>
    %48 = arith.mulf %12, %37 : vector<8x128xf32>
    %49 = arith.subf %48, %25 : vector<8x128xf32>
    %50 = vector.extract_strided_slice %8 {offsets = [3, 0], sizes = [1, 128], strides = [1, 1]} : vector<5x128xf32> to vector<1x128xf32>
    %51 = vector.broadcast %50 : vector<1x128xf32> to vector<8x128xf32>
    %52 = arith.mulf %51, %47 : vector<8x128xf32>
    %53 = arith.addf %45, %52 : vector<8x128xf32>
    %54 = vector.extract_strided_slice %9 {offsets = [3, 0], sizes = [1, 128], strides = [1, 1]} : vector<5x128xf32> to vector<1x128xf32>
    %55 = vector.broadcast %54 : vector<1x128xf32> to vector<8x128xf32>
    %56 = arith.mulf %55, %49 : vector<8x128xf32>
    %57 = arith.addf %53, %56 : vector<8x128xf32>
    %58 = arith.mulf %12, %47 : vector<8x128xf32>
    %59 = arith.subf %58, %35 : vector<8x128xf32>
    %60 = arith.mulf %12, %49 : vector<8x128xf32>
    %61 = arith.subf %60, %37 : vector<8x128xf32>
    %62 = vector.extract_strided_slice %8 {offsets = [4, 0], sizes = [1, 128], strides = [1, 1]} : vector<5x128xf32> to vector<1x128xf32>
    %63 = vector.broadcast %62 : vector<1x128xf32> to vector<8x128xf32>
    %64 = arith.mulf %63, %59 : vector<8x128xf32>
    %65 = arith.addf %57, %64 : vector<8x128xf32>
    %66 = vector.extract_strided_slice %9 {offsets = [4, 0], sizes = [1, 128], strides = [1, 1]} : vector<5x128xf32> to vector<1x128xf32>
    %67 = vector.broadcast %66 : vector<1x128xf32> to vector<8x128xf32>
    %68 = arith.mulf %67, %61 : vector<8x128xf32>
    %69 = arith.addf %65, %68 : vector<8x128xf32>
    %c0_10 = arith.constant 0 : index
    %c0_11 = arith.constant 0 : index
    %70 = vector.load %arg7[%c0_10, %c0_11] : memref<8x128xf32, #tpu.memory_space<vmem>>, vector<8x128xf32>
    tpu.vector_store %arg7[%c0_10, %c0_11], %69 {strides = array<i32>} : memref<8x128xf32, #tpu.memory_space<vmem>>, vector<8x128xf32>,
    return
  }
  func.func @transform_0(%arg0: i32, %arg1: i32) -> (i32, i32) {
    %c0_i32 = arith.constant 0 : i32
    %c0_i32_0 = arith.constant 0 : i32
    return %arg1, %c0_i32 : i32, i32
  }
  func.func @transform_1(%arg0: i32, %arg1: i32) -> (i32, i32) {
    %c0_i32 = arith.constant 0 : i32
    %c0_i32_0 = arith.constant 0 : i32
    return %c0_i32, %arg0 : i32, i32
  }
  func.func @transform_2(%arg0: i32, %arg1: i32) -> (i32, i32) {
    %c0_i32 = arith.constant 0 : i32
    %c0_i32_0 = arith.constant 0 : i32
    return %c0_i32, %arg0 : i32, i32
  }
  func.func @transform_3(%arg0: i32, %arg1: i32) -> (i32, i32) {
    %c0_i32 = arith.constant 0 : i32
    %c0_i32_0 = arith.constant 0 : i32
    return %c0_i32, %arg0 : i32, i32
  }
  func.func @transform_4(%arg0: i32, %arg1: i32) -> (i32, i32) {
    %c0_i32 = arith.constant 0 : i32
    %c0_i32_0 = arith.constant 0 : i32
    return %c0_i32, %arg0 : i32, i32
  }
  func.func @transform_5(%arg0: i32, %arg1: i32) -> (i32, i32) {
    %c0_i32 = arith.constant 0 : i32
    return %arg1, %arg0 : i32, i32
  }
}

</mosaic_0001>

<bundles_post_ra>
// kernel: tpu_custom_call.1
= control target key start
LH: loop header
LB: loop body
LE: loop exit
PB: predicated region body
PF: predicated region fallthrough
CT: control target
= control target key end

     0   :  { %10 = vsyncpa [#allocation3], 0  ;;  %s583_s0 = inlined_call_operand.vmem [shape: f32[8,1], index: 0, kind: input, shape index: {}]   ;;  %s584_s1 = inlined_call_operand.hbm [shape: f32[1,128], index: 1, kind: input, shape index: {}]   ;;  %s585_s2 = inlined_call_operand.hbm [shape: f32[1,128], index: 2, kind: input, shape index: {}]   ;;  %s586_s3 = inlined_call_operand.vmem [shape: f32[5,128], index: 3, kind: input, shape index: {}]   ;;  %s587_s4 = inlined_call_operand.vmem [shape: f32[5,128], index: 4, kind: input, shape index: {}]   ;;  %s588_s5 = inlined_call_operand.hbm [shape: f32[8,128], index: 5, kind: output, shape index: {}]  }
   0x1   :  { %11 = vsyncpa [#allocation6], 0 }
   0x2   :  { %12 = vsyncpa [#allocation4], 0  ;;  %s470_s18 = smov [#allocation2]   ;;  %s471_s20 = smov [#allocation5]  }
   0x3   :  { %s21_s19 = sshll.u32 %s470_s18, 4  ;;  %s31_s21 = sshll.u32 %s471_s20, 4  ;;  %s22_s19 = int_to_ptr.vmem [resolvable:$true] %s21_s19  ;;  %s32_s21 = int_to_ptr.vmem [resolvable:$true] %s31_s21 }
   0x4   :  { %s398_s24 = scalar_lea.hbm %s584_s1, 16 }
   0x5   :  { %p399_p0 = scmp.ne.s32.totalorder %s584_s1, %s398_s24  ;;  %p402_p1 = scmp.lt.u32.totalorder %s398_s24, %s584_s1 }
   0x7   :  { %p404_p2 = pnand %p402_p1, %p399_p0 }
   0x9   :  { %407 = shalt.err (!%p404_p2)
}
   0xa   :  { %s408_s29 = scalar_lea.vmem %s22_s19, 16  ;;  %s412_s30 = scalar_lea.vmem %s22_s19, 32 }
   0xb   :  { %p409_p3 = scmp.ne.s32.totalorder %s22_s19, %s408_s29  ;;  %p413_p4 = scmp.lt.s32.totalorder %s22_s19, %s22_s19 }
   0xc   :  { %p414_p5 = scmp.lt.s32.totalorder %s412_s30, %s408_s29 }
   0xe   :  { %p415_p6 = por %p414_p5, %p413_p4 }
  0x10   :  { %p416_p7 = pnand %p415_p6, %p409_p3 }
  0x12   :  { %419 = shalt.err (!%p416_p7)
}
  0x13   :  { %24 = dma.hbm_to_vmem [thread:$0]  %s584_s1, 16, %s22_s19, [#allocation3]  }
  0x14   :  { %s420_s10 = scalar_lea.hbm %s585_s2, 16 }
  0x15   :  { %p421_p8 = scmp.ne.s32.totalorder %s585_s2, %s420_s10  ;;  %p424_p9 = scmp.lt.u32.totalorder %s420_s10, %s585_s2 }
  0x17   :  { %p426_p10 = pnand %p424_p9, %p421_p8 }
  0x19   :  { %429 = shalt.err (!%p426_p10)
}
  0x1a   :  { %s430_s15 = scalar_lea.vmem %s32_s21, 16  ;;  %s434_s16 = scalar_lea.vmem %s32_s21, 32 }
  0x1b   :  { %p431_p11 = scmp.ne.s32.totalorder %s32_s21, %s430_s15  ;;  %p435_p12 = scmp.lt.s32.totalorder %s32_s21, %s32_s21 }
  0x1c   :  { %p436_p13 = scmp.lt.s32.totalorder %s434_s16, %s430_s15 }
  0x1e   :  { %p437_p0 = por %p436_p13, %p435_p12 }
  0x20   :  { %p438_p1 = pnand %p437_p0, %p431_p11 }
  0x22   :  { %441 = shalt.err (!%p438_p1)
}
  0x23   :  { %34 = dma.hbm_to_vmem [thread:$0]  %s585_s2, 16, %s32_s21, [#allocation6]  }
  0x24   :  { %464 = dma.done.wait [#allocation3], 16  }
  0x25   :  { %465 = vsyncadd [#allocation3], 4294967280 }
  0x26   :  { %466 = dma.done.wait [#allocation6], 16  }
  0x27   :  { %467 = vsyncadd [#allocation6], 4294967280  ;;  %v472_v0 = vmov 0   ;;  %v45_v1 = vld [vmem:[%s583_s0] sm:$0xff]  ;;  %v368_v2 = vld [vmem:[#allocation2] ss:$0 sm:$0xff] }
  0x28   :  { %393 = vset.pattern.permute.xlu0 %v472_v0  ;;  %v369_v3 = vld [vmem:[#allocation5] ss:$0 sm:$0xff]  ;;  %v473_v17 = vmov 683565275   ;;  %v474_v19 = vmov 2475754826  }
  0x29   :  { %50 = vperm.xlu0 %393, %v45_v1   ;;  %v475_v22 = vmov 2131351028   ;;  %v476_v25 = vmov 2102212464   ;;  %v477_v28 = vmov 920167782  }
  0x2a   :  { %v478_v31 = vmov 1326507024  }
  0xa8   :  { %v51_v4 = vpop.permute.xlu0 %50 }
  0xa9   :  { %v59_v5 = vmul.f32 %v368_v2, %v51_v4 }
  0xab   :  { %v537_v6 = vadd.f32 %v369_v3, %v59_v5 }
  0xad   :  { %v72_v7 = vand.u32 2139095040, %v537_v6  ;;  %v69_v11 = vand.u32 2147483647, %v537_v6  ;;  %vm71_vm7 = vcmp.lt.s32.totalorder %v537_v6, 0  ;;  %vm161_vm15 = vweird.f32 %v537_v6 }
  0xaf   :  { %v73_v8 = vshrl.u32 %v72_v7, 23  ;;  %v76_v14 = vand.u32 8388607, %v69_v11  ;;  %vm70_vm8 = vcmp.le.f32.partialorder %v69_v11, 0.7853982 }
  0xb1   :  { %v370_v9 = vadd.s32 4294967169, %v73_v8  ;;  %v77_v33 = vor.u32 8388608, %v76_v14 }
  0xb3   :  { %v79_v10 = vadd.s32 1, %v370_v9  ;;  %v117_v47 = vshll.u32 %v77_v33, 8 }
  0xb5   :  { %vm80_vm0 = vcmp.gt.s32.totalorder %v79_v10, 0 }
  0xb6   :  { %v81_v12 = vsel %vm80_vm0, %v79_v10, 0 }
  0xb7   :  { %v83_v13 = vand.u32 31, %v81_v12  ;;  %v82_v16 = vshrl.u32 %v81_v12, 5 }
  0xb9   :  { %v84_v15 = vsub.s32 32, %v83_v13  ;;  %v86_v18 = vshll.u32 %v473_v17, %v83_v13  ;;  %v89_v20 = vshll.u32 %v474_v19, %v83_v13  ;;  %v92_v24 = vshll.u32 %v475_v22, %v83_v13 }
  0xba   :  { %v95_v27 = vshll.u32 %v476_v25, %v83_v13  ;;  %v98_v30 = vshll.u32 %v477_v28, %v83_v13  ;;  %vm101_vm1 = vcmp.lt.s32.totalorder %v82_v16, 1  ;;  %vm104_vm2 = vcmp.lt.s32.totalorder %v82_v16, 4 }
  0xbb   :  { %v87_v21 = vshrl.u32 %v474_v19, %v84_v15  ;;  %v90_v23 = vshrl.u32 %v475_v22, %v84_v15  ;;  %v93_v26 = vshrl.u32 %v476_v25, %v84_v15  ;;  %v96_v29 = vshrl.u32 %v477_v28, %v84_v15 }
  0xbc   :  { %v99_v32 = vshrl.u32 %v478_v31, %v84_v15  ;;  %v85_v42 = vshrl.u32 %v473_v17, %v84_v15  ;;  %vm103_vm3 = vcmp.lt.s32.totalorder %v82_v16, 3  ;;  %vm102_vm4 = vcmp.lt.s32.totalorder %v82_v16, 2 }
  0xbd   :  { %v88_v34 = vor.u32 %v87_v21, %v86_v18  ;;  %v91_v35 = vor.u32 %v90_v23, %v89_v20  ;;  %v94_v36 = vor.u32 %v93_v26, %v92_v24  ;;  %v97_v37 = vor.u32 %v96_v29, %v95_v27 }
  0xbe   :  { %v100_v38 = vor.u32 %v99_v32, %v98_v30  ;;  %v277_v25 = vlaneseq  ;;  %v67_v32 = vld [vmem:[%s586_s3] sm:$0x1f]  ;;  %s479_s3 = smov [#allocation7]  }
  0xbf   :  { %v106_v39 = vsel %vm104_vm2, %v94_v36, 2102212464  ;;  %v109_v40 = vsel %vm101_vm1, %v88_v34, %v91_v35  ;;  %v113_v41 = vsel %vm101_vm1, %v91_v35, %v94_v36  ;;  %v110_v43 = vsel %vm104_vm2, %v97_v37, 920167782 }
  0xc0   :  { %v114_v44 = vsel %vm104_vm2, %v100_v38, 1326507024  ;;  %v111_v45 = vsel %vm103_vm3, %v94_v36, %v110_v43  ;;  %v105_v48 = vsel %vm101_vm1, %v85_v42, %v88_v34  ;;  %v107_v49 = vsel %vm103_vm3, %v91_v35, %v106_v39  ;;  %v68_v36 = vld [vmem:[%s587_s4] sm:$0x1f]  ;;  %s358_s4 = sshll.u32 %s479_s3, 4  ;;  %s359_s4 = int_to_ptr.vmem [resolvable:$true] %s358_s4 }
  0xc1   :  { %v115_v46 = vsel %vm103_vm3, %v97_v37, %v114_v44  ;;  %v112_v50 = vsel %vm102_vm4, %v109_v40, %v111_v45  ;;  %v108_v56 = vsel %vm102_vm4, %v105_v48, %v107_v49  ;;  %v557_v28 = vshrl.u32 %v277_v25, 7  ;;  %s442_s22 = scalar_lea.vmem %s359_s4, 128  ;;  %p447_p3 = scmp.lt.s32.totalorder %s359_s4, %s359_s4 }
  0xc2   :  { %v116_v51 = vsel %vm102_vm4, %v113_v41, %v115_v46  ;;  %v546_v54 = vmul.u32.u64.low %v117_v47, %v112_v50  ;;  %v547_v55 = vmul.u32.u64.high %v117_v47, %v112_v50, %v546_v54  ;;  %v124_v58 = vmul.u32 %v117_v47, %v108_v56  ;;  %p443_p2 = scmp.ne.s32.totalorder %s359_s4, %s442_s22  ;;  %p448_p4 = scmp.lt.s32.totalorder %s442_s22, %s442_s22 }
  0xc3   :  { %v543_v52 = vmul.u32.u64.low %v117_v47, %v116_v51  ;;  %v544_v53 = vmul.u32.u64.high %v117_v47, %v116_v51, %v543_v52  ;;  %v279_v31 = vsub.s32 0, %v557_v28  ;;  %v293_v47 = vsub.s32 1, %v557_v28 }
  0xc4   :  { %v127_v57 = vadd.s32 1, %v547_v55  ;;  %p449_p5 = por %p448_p4, %p447_p3 }
  0xc5   :  { %vm126_vm5 = vc.u32 %v544_v53, %v546_v54  ;;  %v125_v7 = vadd.s32 %v546_v54, %v544_v53  ;;  %v280_v37 = vrot.slane %v67_v32, %v279_v31  ;;  %v285_v44 = vrot.slane %v68_v36, %v279_v31 }
  0xc6   :  { %v128_v59 = vsel %vm126_vm5, %v127_v57, %v547_v55  ;;  %v294_v49 = vrot.slane %v67_v32, %v293_v47  ;;  %v309_v54 = vsub.s32 2, %v557_v28  ;;  %v300_v56 = vrot.slane %v68_v36, %v293_v47  ;;  %p450_p6 = pnand %p449_p5, %p443_p2 }
  0xc7   :  { %v129_v60 = vadd.s32 %v128_v59, %v124_v58 }
  0xc8   :  { %v310_v58 = vrot.slane %v67_v32, %v309_v54 }
  0xc9   :  { %v130_v61 = vadd.s32 536870912, %v129_v60 }
  0xcb   :  { %v131_v62 = vshrl.u32 %v130_v61, 30 }
  0xcd   :  { %v132_v63 = vshll.u32 %v131_v62, 30  ;;  %v155_v20 = vsub.s32 4, %v131_v62 }
  0xcf   :  { %v133_v0 = vsub.s32 %v129_v60, %v132_v63  ;;  %v156_v23 = vsel %vm71_vm7, %v155_v20, %v131_v62  ;;  %v316_v62 = vrot.slane %v68_v36, %v309_v54  ;;  %v325_v63 = vsub.s32 3, %v557_v28 }
  0xd0   :  { %v158_v26 = vsel %vm70_vm8, 0, %v156_v23 }
  0xd1   :  { %v135_v1 = vsub.s32 0, %v133_v0  ;;  %v265_v27 = vadd.s32 3, %v158_v26  ;;  %v162_v29 = vand.u32 3, %v158_v26 }
  0xd3   :  { %v371_v2 = vmin.u32 %v135_v1, %v133_v0  ;;  %v266_v30 = vand.u32 3, %v265_v27  ;;  %vm167_vm9 = vcmp.eq.s32.totalorder %v162_v29, 2  ;;  %vm164_vm11 = vcmp.eq.s32.totalorder %v162_v29, 0 }
  0xd4   :  { %vm163_vm13 = vcmp.lt.s32.totalorder %v162_v29, 2 }
  0xd5   :  { %v137_v3 = vclz %v371_v2  ;;  %vm271_vm10 = vcmp.eq.s32.totalorder %v266_v30, 2  ;;  %vm268_vm12 = vcmp.eq.s32.totalorder %v266_v30, 0  ;;  %vm267_vm14 = vcmp.lt.s32.totalorder %v266_v30, 2 }
  0xd7   :  { %v372_v4 = vadd.s32 4294967294, %v137_v3 }
  0xd9   :  { %vm373_vm6 = vcmp.lt.s32.totalorder %v372_v4, 0 }
  0xda   :  { %v140_v5 = vsel %vm373_vm6, 0, %v372_v4  ;;  %v326_v4 = vrot.slane %v67_v32, %v325_v63 }
  0xdb   :  { %v141_v8 = vsub.s32 32, %v140_v5  ;;  %v145_v9 = vsub.s32 4294967266, %v140_v5  ;;  %v142_v10 = vshll.u32 %v133_v0, %v140_v5 }
  0xdd   :  { %v143_v12 = vshrl.u32 %v125_v7, %v141_v8  ;;  %v146_v13 = vadd.s32 127, %v145_v9 }
  0xdf   :  { %v144_v14 = vor.u32 %v143_v12, %v142_v10  ;;  %v147_v15 = vshll.u32 %v146_v13, 23  ;;  %v332_v10 = vrot.slane %v68_v36, %v325_v63  ;;  %v341_v12 = vsub.s32 4, %v557_v28 }
  0xe1   :  { %v148_v16 = vor.u32 4788187, %v147_v15  ;;  %v151_v18 = vcvt.s32.f32 %v144_v14  ;;  %v342_v20 = vrot.slane %v67_v32, %v341_v12 }
  0xe3   :  { %v149_v17 = vand.u32 2147483647, %v148_v16 }
  0xe5   :  { %v152_v19 = vmul.f32 %v151_v18, %v149_v17 }
  0xe7   :  { %v153_v21 = vxor.u32 2147483648, %v152_v19 }
  0xe9   :  { %v154_v22 = vsel %vm71_vm7, %v153_v21, %v152_v19  ;;  %v348_v21 = vrot.slane %v68_v36, %v341_v12 }
  0xea   :  { %v157_v24 = vsel %vm70_vm8, %v537_v6, %v154_v22 }
  0xeb   :  { %394 = vcosq.f32 %v157_v24 }
  0xec   :  { %396 = vsinq.f32 %v157_v24 }
  0xf5   :  { %v395_v11 = vpop.eup %394 }
  0xf6   :  { %v397_v33 = vpop.eup %396  ;;  %v168_v34 = vxor.u32 2147483648, %v395_v11 }
  0xf7   :  { %v165_v35 = vxor.u32 2147483648, %v397_v33 }
  0xf8   :  { %v169_v38 = vsel %vm167_vm9, %v168_v34, %v397_v33  ;;  %v273_v39 = vsel %vm271_vm10, %v168_v34, %v397_v33 }
  0xf9   :  { %v166_v40 = vsel %vm164_vm11, %v395_v11, %v165_v35  ;;  %v270_v41 = vsel %vm268_vm12, %v395_v11, %v165_v35 }
  0xfa   :  { %v170_v42 = vsel %vm163_vm13, %v166_v40, %v169_v38  ;;  %v274_v43 = vsel %vm267_vm14, %v270_v41, %v273_v39 }
  0xfb   :  { %v171_v45 = vsel %vm161_vm15, nan, %v170_v42  ;;  %v275_v46 = vsel %vm161_vm15, nan, %v274_v43 }
  0xfc   :  { %v276_v48 = vadd.f32 %v171_v45, %v171_v45  ;;  %v281_v50 = vmul.f32 %v280_v37, %v171_v45  ;;  %v286_v51 = vmul.f32 %v285_v44, %v275_v46 }
  0xfe   :  { %v288_v52 = vmul.f32 %v276_v48, %v171_v45  ;;  %v290_v53 = vmul.f32 %v276_v48, %v275_v46  ;;  %v287_v6 = vadd.f32 %v286_v51, %v281_v50 }
 0x100   :  { %v378_v55 = vadd.f32 -1.0, %v288_v52  ;;  %v305_v57 = vmul.f32 %v290_v53, %v276_v48  ;;  %v301_v1 = vmul.f32 %v300_v56, %v290_v53 }
 0x102   :  { %v295_v59 = vmul.f32 %v378_v55, %v294_v49  ;;  %v303_v60 = vmul.f32 %v378_v55, %v276_v48  ;;  %v306_v61 = vsub.f32 %v305_v57, %v275_v46 }
 0x104   :  { %v296_v0 = vadd.f32 %v295_v59, %v287_v6  ;;  %v304_v2 = vsub.f32 %v303_v60, %v171_v45  ;;  %v321_v3 = vmul.f32 %v306_v61, %v276_v48  ;;  %v317_v14 = vmul.f32 %v316_v62, %v306_v61 }
 0x106   :  { %v302_v5 = vadd.f32 %v301_v1, %v296_v0  ;;  %v311_v7 = vmul.f32 %v310_v58, %v304_v2  ;;  %v319_v8 = vmul.f32 %v304_v2, %v276_v48  ;;  %v322_v9 = vsub.f32 %v321_v3, %v290_v53 }
 0x108   :  { %v312_v13 = vadd.f32 %v311_v7, %v302_v5  ;;  %v320_v15 = vsub.f32 %v319_v8, %v378_v55  ;;  %v337_v16 = vmul.f32 %v322_v9, %v276_v48  ;;  %v333_v23 = vmul.f32 %v332_v10, %v322_v9 }
 0x10a   :  { %v318_v17 = vadd.f32 %v317_v14, %v312_v13  ;;  %v327_v18 = vmul.f32 %v326_v4, %v320_v15  ;;  %v335_v19 = vmul.f32 %v320_v15, %v276_v48  ;;  %v338_v25 = vsub.f32 %v337_v16, %v306_v61 }
 0x10c   :  { %v328_v22 = vadd.f32 %v327_v18, %v318_v17  ;;  %v336_v24 = vsub.f32 %v335_v19, %v304_v2  ;;  %v349_v30 = vmul.f32 %v348_v21, %v338_v25 }
 0x10e   :  { %v334_v26 = vadd.f32 %v333_v23, %v328_v22  ;;  %v343_v27 = vmul.f32 %v342_v20, %v336_v24 }
 0x110   :  { %v344_v29 = vadd.f32 %v343_v27, %v334_v26 }
 0x112   :  { %v350_v28 = vadd.f32 %v349_v30, %v344_v29 }
 0x114   :  { %351 = vst [vmem:[#allocation7] sm:$0xff] %v350_v28 }
 0x115   :  { %453 = shalt.err (!%p450_p6)
}
 0x116   :  { %s454_s25 = scalar_lea.hbm %s588_s5, 128 }
 0x117   :  { %p455_p7 = scmp.ne.s32.totalorder %s588_s5, %s454_s25  ;;  %p458_p8 = scmp.lt.u32.totalorder %s454_s25, %s588_s5 }
 0x119   :  { %p460_p9 = pnand %p458_p8, %p455_p7 }
 0x11b   :  { %463 = shalt.err (!%p460_p9)
}
 0x11c   :  { %361 = dma.vmem_to_hbm [thread:$0]  %s359_s4, 128, %s588_s5, [#allocation4]  }
 0x11d   :  { %468 = dma.done.wait [#allocation4], 128  }
 0x11e   :  { %469 = vsyncadd [#allocation4], 4294967168 }
 0x11f   :  { %365 = vsyncpa [#allocation3], 1 }
 0x120   :  { %366 = vsyncpa [#allocation6], 1 }
 0x121   :  { %367 = vsyncpa [#allocation4], 1 }

// kernel: tpu_custom_call.1
= control target key start
LH: loop header
LB: loop body
LE: loop exit
PB: predicated region body
PF: predicated region fallthrough
CT: control target
= control target key end

     0   :  { %10 = vsyncpa [#allocation3], 0  ;;  %s583_s0 = inlined_call_operand.vmem [shape: f32[8,1], index: 0, kind: input, shape index: {}]   ;;  %s584_s1 = inlined_call_operand.hbm [shape: f32[1,128], index: 1, kind: input, shape index: {}]   ;;  %s585_s2 = inlined_call_operand.hbm [shape: f32[1,128], index: 2, kind: input, shape index: {}]   ;;  %s586_s3 = inlined_call_operand.vmem [shape: f32[5,128], index: 3, kind: input, shape index: {}]   ;;  %s587_s4 = inlined_call_operand.vmem [shape: f32[5,128], index: 4, kind: input, shape index: {}]   ;;  %s588_s5 = inlined_call_operand.hbm [shape: f32[8,128], index: 5, kind: output, shape index: {}]  }
   0x1   :  { %11 = vsyncpa [#allocation6], 0 }
   0x2   :  { %12 = vsyncpa [#allocation4], 0  ;;  %s470_s18 = smov [#allocation2]   ;;  %s471_s20 = smov [#allocation5]  }
   0x3   :  { %s21_s19 = sshll.u32 %s470_s18, 4  ;;  %s31_s21 = sshll.u32 %s471_s20, 4  ;;  %s22_s19 = int_to_ptr.vmem [resolvable:$true] %s21_s19  ;;  %s32_s21 = int_to_ptr.vmem [resolvable:$true] %s31_s21 }
   0x4   :  { %s398_s24 = scalar_lea.hbm %s584_s1, 16 }
   0x5   :  { %p399_p0 = scmp.ne.s32.totalorder %s584_s1, %s398_s24  ;;  %p402_p1 = scmp.lt.u32.totalorder %s398_s24, %s584_s1 }
   0x7   :  { %p404_p2 = pnand %p402_p1, %p399_p0 }
   0x9   :  { %407 = shalt.err (!%p404_p2)
}
   0xa   :  { %s408_s29 = scalar_lea.vmem %s22_s19, 16  ;;  %s412_s30 = scalar_lea.vmem %s22_s19, 32 }
   0xb   :  { %p409_p3 = scmp.ne.s32.totalorder %s22_s19, %s408_s29  ;;  %p413_p4 = scmp.lt.s32.totalorder %s22_s19, %s22_s19 }
   0xc   :  { %p414_p5 = scmp.lt.s32.totalorder %s412_s30, %s408_s29 }
   0xe   :  { %p415_p6 = por %p414_p5, %p413_p4 }
  0x10   :  { %p416_p7 = pnand %p415_p6, %p409_p3 }
  0x12   :  { %419 = shalt.err (!%p416_p7)
}
  0x13   :  { %24 = dma.hbm_to_vmem [thread:$0]  %s584_s1, 16, %s22_s19, [#allocation3]  }
  0x14   :  { %s420_s10 = scalar_lea.hbm %s585_s2, 16 }
  0x15   :  { %p421_p8 = scmp.ne.s32.totalorder %s585_s2, %s420_s10  ;;  %p424_p9 = scmp.lt.u32.totalorder %s420_s10, %s585_s2 }
  0x17   :  { %p426_p10 = pnand %p424_p9, %p421_p8 }
  0x19   :  { %429 = shalt.err (!%p426_p10)
}
  0x1a   :  { %s430_s15 = scalar_lea.vmem %s32_s21, 16  ;;  %s434_s16 = scalar_lea.vmem %s32_s21, 32 }
  0x1b   :  { %p431_p11 = scmp.ne.s32.totalorder %s32_s21, %s430_s15  ;;  %p435_p12 = scmp.lt.s32.totalorder %s32_s21, %s32_s21 }
  0x1c   :  { %p436_p13 = scmp.lt.s32.totalorder %s434_s16, %s430_s15 }
  0x1e   :  { %p437_p0 = por %p436_p13, %p435_p12 }
  0x20   :  { %p438_p1 = pnand %p437_p0, %p431_p11 }
  0x22   :  { %441 = shalt.err (!%p438_p1)
}
  0x23   :  { %34 = dma.hbm_to_vmem [thread:$0]  %s585_s2, 16, %s32_s21, [#allocation6]  }
  0x24   :  { %464 = dma.done.wait [#allocation3], 16  }
  0x25   :  { %465 = vsyncadd [#allocation3], 4294967280 }
  0x26   :  { %466 = dma.done.wait [#allocation6], 16  }
  0x27   :  { %467 = vsyncadd [#allocation6], 4294967280  ;;  %v472_v0 = vmov 0   ;;  %v45_v1 = vld [vmem:[%s583_s0] sm:$0xff]  ;;  %v368_v2 = vld [vmem:[#allocation2] ss:$0 sm:$0xff] }
  0x28   :  { %393 = vset.pattern.permute.xlu0 %v472_v0  ;;  %v369_v3 = vld [vmem:[#allocation5] ss:$0 sm:$0xff]  ;;  %v473_v17 = vmov 683565275   ;;  %v474_v19 = vmov 2475754826  }
  0x29   :  { %50 = vperm.xlu0 %393, %v45_v1   ;;  %v475_v22 = vmov 2131351028   ;;  %v476_v25 = vmov 2102212464   ;;  %v477_v28 = vmov 920167782  }
  0x2a   :  { %v478_v31 = vmov 1326507024  }
  0xa8   :  { %v51_v4 = vpop.permute.xlu0 %50 }
  0xa9   :  { %v59_v5 = vmul.f32 %v368_v2, %v51_v4 }
  0xab   :  { %v537_v6 = vadd.f32 %v369_v3, %v59_v5 }
  0xad   :  { %v72_v7 = vand.u32 2139095040, %v537_v6  ;;  %v69_v11 = vand.u32 2147483647, %v537_v6  ;;  %vm71_vm7 = vcmp.lt.s32.totalorder %v537_v6, 0  ;;  %vm161_vm15 = vweird.f32 %v537_v6 }
  0xaf   :  { %v73_v8 = vshrl.u32 %v72_v7, 23  ;;  %v76_v14 = vand.u32 8388607, %v69_v11  ;;  %vm70_vm8 = vcmp.le.f32.partialorder %v69_v11, 0.7853982 }
  0xb1   :  { %v370_v9 = vadd.s32 4294967169, %v73_v8  ;;  %v77_v33 = vor.u32 8388608, %v76_v14 }
  0xb3   :  { %v79_v10 = vadd.s32 1, %v370_v9  ;;  %v117_v47 = vshll.u32 %v77_v33, 8 }
  0xb5   :  { %vm80_vm0 = vcmp.gt.s32.totalorder %v79_v10, 0 }
  0xb6   :  { %v81_v12 = vsel %vm80_vm0, %v79_v10, 0 }
  0xb7   :  { %v83_v13 = vand.u32 31, %v81_v12  ;;  %v82_v16 = vshrl.u32 %v81_v12, 5 }
  0xb9   :  { %v84_v15 = vsub.s32 32, %v83_v13  ;;  %v86_v18 = vshll.u32 %v473_v17, %v83_v13  ;;  %v89_v20 = vshll.u32 %v474_v19, %v83_v13  ;;  %v92_v24 = vshll.u32 %v475_v22, %v83_v13 }
  0xba   :  { %v95_v27 = vshll.u32 %v476_v25, %v83_v13  ;;  %v98_v30 = vshll.u32 %v477_v28, %v83_v13  ;;  %vm101_vm1 = vcmp.lt.s32.totalorder %v82_v16, 1  ;;  %vm104_vm2 = vcmp.lt.s32.totalorder %v82_v16, 4 }
  0xbb   :  { %v87_v21 = vshrl.u32 %v474_v19, %v84_v15  ;;  %v90_v23 = vshrl.u32 %v475_v22, %v84_v15  ;;  %v93_v26 = vshrl.u32 %v476_v25, %v84_v15  ;;  %v96_v29 = vshrl.u32 %v477_v28, %v84_v15 }
  0xbc   :  { %v99_v32 = vshrl.u32 %v478_v31, %v84_v15  ;;  %v85_v42 = vshrl.u32 %v473_v17, %v84_v15  ;;  %vm103_vm3 = vcmp.lt.s32.totalorder %v82_v16, 3  ;;  %vm102_vm4 = vcmp.lt.s32.totalorder %v82_v16, 2 }
  0xbd   :  { %v88_v34 = vor.u32 %v87_v21, %v86_v18  ;;  %v91_v35 = vor.u32 %v90_v23, %v89_v20  ;;  %v94_v36 = vor.u32 %v93_v26, %v92_v24  ;;  %v97_v37 = vor.u32 %v96_v29, %v95_v27 }
  0xbe   :  { %v100_v38 = vor.u32 %v99_v32, %v98_v30  ;;  %v277_v25 = vlaneseq  ;;  %v67_v32 = vld [vmem:[%s586_s3] sm:$0x1f]  ;;  %s479_s3 = smov [#allocation7]  }
  0xbf   :  { %v106_v39 = vsel %vm104_vm2, %v94_v36, 2102212464  ;;  %v109_v40 = vsel %vm101_vm1, %v88_v34, %v91_v35  ;;  %v113_v41 = vsel %vm101_vm1, %v91_v35, %v94_v36  ;;  %v110_v43 = vsel %vm104_vm2, %v97_v37, 920167782 }
  0xc0   :  { %v114_v44 = vsel %vm104_vm2, %v100_v38, 1326507024  ;;  %v111_v45 = vsel %vm103_vm3, %v94_v36, %v110_v43  ;;  %v105_v48 = vsel %vm101_vm1, %v85_v42, %v88_v34  ;;  %v107_v49 = vsel %vm103_vm3, %v91_v35, %v106_v39  ;;  %v68_v36 = vld [vmem:[%s587_s4] sm:$0x1f]  ;;  %s358_s4 = sshll.u32 %s479_s3, 4  ;;  %s359_s4 = int_to_ptr.vmem [resolvable:$true] %s358_s4 }
  0xc1   :  { %v115_v46 = vsel %vm103_vm3, %v97_v37, %v114_v44  ;;  %v112_v50 = vsel %vm102_vm4, %v109_v40, %v111_v45  ;;  %v108_v56 = vsel %vm102_vm4, %v105_v48, %v107_v49  ;;  %v557_v28 = vshrl.u32 %v277_v25, 7  ;;  %s442_s22 = scalar_lea.vmem %s359_s4, 128  ;;  %p447_p3 = scmp.lt.s32.totalorder %s359_s4, %s359_s4 }
  0xc2   :  { %v116_v51 = vsel %vm102_vm4, %v113_v41, %v115_v46  ;;  %v546_v54 = vmul.u32.u64.low %v117_v47, %v112_v50  ;;  %v547_v55 = vmul.u32.u64.high %v117_v47, %v112_v50, %v546_v54  ;;  %v124_v58 = vmul.u32 %v117_v47, %v108_v56  ;;  %p443_p2 = scmp.ne.s32.totalorder %s359_s4, %s442_s22  ;;  %p448_p4 = scmp.lt.s32.totalorder %s442_s22, %s442_s22 }
  0xc3   :  { %v543_v52 = vmul.u32.u64.low %v117_v47, %v116_v51  ;;  %v544_v53 = vmul.u32.u64.high %v117_v47, %v116_v51, %v543_v52  ;;  %v279_v31 = vsub.s32 0, %v557_v28  ;;  %v293_v47 = vsub.s32 1, %v557_v28 }
  0xc4   :  { %v127_v57 = vadd.s32 1, %v547_v55  ;;  %p449_p5 = por %p448_p4, %p447_p3 }
  0xc5   :  { %vm126_vm5 = vc.u32 %v544_v53, %v546_v54  ;;  %v125_v7 = vadd.s32 %v546_v54, %v544_v53  ;;  %v280_v37 = vrot.slane %v67_v32, %v279_v31  ;;  %v285_v44 = vrot.slane %v68_v36, %v279_v31 }
  0xc6   :  { %v128_v59 = vsel %vm126_vm5, %v127_v57, %v547_v55  ;;  %v294_v49 = vrot.slane %v67_v32, %v293_v47  ;;  %v309_v54 = vsub.s32 2, %v557_v28  ;;  %v300_v56 = vrot.slane %v68_v36, %v293_v47  ;;  %p450_p6 = pnand %p449_p5, %p443_p2 }
  0xc7   :  { %v129_v60 = vadd.s32 %v128_v59, %v124_v58 }
  0xc8   :  { %v310_v58 = vrot.slane %v67_v32, %v309_v54 }
  0xc9   :  { %v130_v61 = vadd.s32 536870912, %v129_v60 }
  0xcb   :  { %v131_v62 = vshrl.u32 %v130_v61, 30 }
  0xcd   :  { %v132_v63 = vshll.u32 %v131_v62, 30  ;;  %v155_v20 = vsub.s32 4, %v131_v62 }
  0xcf   :  { %v133_v0 = vsub.s32 %v129_v60, %v132_v63  ;;  %v156_v23 = vsel %vm71_vm7, %v155_v20, %v131_v62  ;;  %v316_v62 = vrot.slane %v68_v36, %v309_v54  ;;  %v325_v63 = vsub.s32 3, %v557_v28 }
  0xd0   :  { %v158_v26 = vsel %vm70_vm8, 0, %v156_v23 }
  0xd1   :  { %v135_v1 = vsub.s32 0, %v133_v0  ;;  %v265_v27 = vadd.s32 3, %v158_v26  ;;  %v162_v29 = vand.u32 3, %v158_v26 }
  0xd3   :  { %v371_v2 = vmin.u32 %v135_v1, %v133_v0  ;;  %v266_v30 = vand.u32 3, %v265_v27  ;;  %vm167_vm9 = vcmp.eq.s32.totalorder %v162_v29, 2  ;;  %vm164_vm11 = vcmp.eq.s32.totalorder %v162_v29, 0 }
  0xd4   :  { %vm163_vm13 = vcmp.lt.s32.totalorder %v162_v29, 2 }
  0xd5   :  { %v137_v3 = vclz %v371_v2  ;;  %vm271_vm10 = vcmp.eq.s32.totalorder %v266_v30, 2  ;;  %vm268_vm12 = vcmp.eq.s32.totalorder %v266_v30, 0  ;;  %vm267_vm14 = vcmp.lt.s32.totalorder %v266_v30, 2 }
  0xd7   :  { %v372_v4 = vadd.s32 4294967294, %v137_v3 }
  0xd9   :  { %vm373_vm6 = vcmp.lt.s32.totalorder %v372_v4, 0 }
  0xda   :  { %v140_v5 = vsel %vm373_vm6, 0, %v372_v4  ;;  %v326_v4 = vrot.slane %v67_v32, %v325_v63 }
  0xdb   :  { %v141_v8 = vsub.s32 32, %v140_v5  ;;  %v145_v9 = vsub.s32 4294967266, %v140_v5  ;;  %v142_v10 = vshll.u32 %v133_v0, %v140_v5 }
  0xdd   :  { %v143_v12 = vshrl.u32 %v125_v7, %v141_v8  ;;  %v146_v13 = vadd.s32 127, %v145_v9 }
  0xdf   :  { %v144_v14 = vor.u32 %v143_v12, %v142_v10  ;;  %v147_v15 = vshll.u32 %v146_v13, 23  ;;  %v332_v10 = vrot.slane %v68_v36, %v325_v63  ;;  %v341_v12 = vsub.s32 4, %v557_v28 }
  0xe1   :  { %v148_v16 = vor.u32 4788187, %v147_v15  ;;  %v151_v18 = vcvt.s32.f32 %v144_v14  ;;  %v342_v20 = vrot.slane %v67_v32, %v341_v12 }
  0xe3   :  { %v149_v17 = vand.u32 2147483647, %v148_v16 }
  0xe5   :  { %v152_v19 = vmul.f32 %v151_v18, %v149_v17 }
  0xe7   :  { %v153_v21 = vxor.u32 2147483648, %v152_v19 }
  0xe9   :  { %v154_v22 = vsel %vm71_vm7, %v153_v21, %v152_v19  ;;  %v348_v21 = vrot.slane %v68_v36, %v341_v12 }
  0xea   :  { %v157_v24 = vsel %vm70_vm8, %v537_v6, %v154_v22 }
  0xeb   :  { %394 = vcosq.f32 %v157_v24 }
  0xec   :  { %396 = vsinq.f32 %v157_v24 }
  0xf5   :  { %v395_v11 = vpop.eup %394 }
  0xf6   :  { %v397_v33 = vpop.eup %396  ;;  %v168_v34 = vxor.u32 2147483648, %v395_v11 }
  0xf7   :  { %v165_v35 = vxor.u32 2147483648, %v397_v33 }
  0xf8   :  { %v169_v38 = vsel %vm167_vm9, %v168_v34, %v397_v33  ;;  %v273_v39 = vsel %vm271_vm10, %v168_v34, %v397_v33 }
  0xf9   :  { %v166_v40 = vsel %vm164_vm11, %v395_v11, %v165_v35  ;;  %v270_v41 = vsel %vm268_vm12, %v395_v11, %v165_v35 }
  0xfa   :  { %v170_v42 = vsel %vm163_vm13, %v166_v40, %v169_v38  ;;  %v274_v43 = vsel %vm267_vm14, %v270_v41, %v273_v39 }
  0xfb   :  { %v171_v45 = vsel %vm161_vm15, nan, %v170_v42  ;;  %v275_v46 = vsel %vm161_vm15, nan, %v274_v43 }
  0xfc   :  { %v276_v48 = vadd.f32 %v171_v45, %v171_v45  ;;  %v281_v50 = vmul.f32 %v280_v37, %v171_v45  ;;  %v286_v51 = vmul.f32 %v285_v44, %v275_v46 }
  0xfe   :  { %v288_v52 = vmul.f32 %v276_v48, %v171_v45  ;;  %v290_v53 = vmul.f32 %v276_v48, %v275_v46  ;;  %v287_v6 = vadd.f32 %v286_v51, %v281_v50 }
 0x100   :  { %v378_v55 = vadd.f32 -1.0, %v288_v52  ;;  %v305_v57 = vmul.f32 %v290_v53, %v276_v48  ;;  %v301_v1 = vmul.f32 %v300_v56, %v290_v53 }
 0x102   :  { %v295_v59 = vmul.f32 %v378_v55, %v294_v49  ;;  %v303_v60 = vmul.f32 %v378_v55, %v276_v48  ;;  %v306_v61 = vsub.f32 %v305_v57, %v275_v46 }
 0x104   :  { %v296_v0 = vadd.f32 %v295_v59, %v287_v6  ;;  %v304_v2 = vsub.f32 %v303_v60, %v171_v45  ;;  %v321_v3 = vmul.f32 %v306_v61, %v276_v48  ;;  %v317_v14 = vmul.f32 %v316_v62, %v306_v61 }
 0x106   :  { %v302_v5 = vadd.f32 %v301_v1, %v296_v0  ;;  %v311_v7 = vmul.f32 %v310_v58, %v304_v2  ;;  %v319_v8 = vmul.f32 %v304_v2, %v276_v48  ;;  %v322_v9 = vsub.f32 %v321_v3, %v290_v53 }
 0x108   :  { %v312_v13 = vadd.f32 %v311_v7, %v302_v5  ;;  %v320_v15 = vsub.f32 %v319_v8, %v378_v55  ;;  %v337_v16 = vmul.f32 %v322_v9, %v276_v48  ;;  %v333_v23 = vmul.f32 %v332_v10, %v322_v9 }
 0x10a   :  { %v318_v17 = vadd.f32 %v317_v14, %v312_v13  ;;  %v327_v18 = vmul.f32 %v326_v4, %v320_v15  ;;  %v335_v19 = vmul.f32 %v320_v15, %v276_v48  ;;  %v338_v25 = vsub.f32 %v337_v16, %v306_v61 }
 0x10c   :  { %v328_v22 = vadd.f32 %v327_v18, %v318_v17  ;;  %v336_v24 = vsub.f32 %v335_v19, %v304_v2  ;;  %v349_v30 = vmul.f32 %v348_v21, %v338_v25 }
 0x10e   :  { %v334_v26 = vadd.f32 %v333_v23, %v328_v22  ;;  %v343_v27 = vmul.f32 %v342_v20, %v336_v24 }
 0x110   :  { %v344_v29 = vadd.f32 %v343_v27, %v334_v26 }
 0x112   :  { %v350_v28 = vadd.f32 %v349_v30, %v344_v29 }
 0x114   :  { %351 = vst [vmem:[#allocation7] sm:$0xff] %v350_v28 }
 0x115   :  { %453 = shalt.err (!%p450_p6)
}
 0x116   :  { %s454_s25 = scalar_lea.hbm %s588_s5, 128 }
 0x117   :  { %p455_p7 = scmp.ne.s32.totalorder %s588_s5, %s454_s25  ;;  %p458_p8 = scmp.lt.u32.totalorder %s454_s25, %s588_s5 }
 0x119   :  { %p460_p9 = pnand %p458_p8, %p455_p7 }
 0x11b   :  { %463 = shalt.err (!%p460_p9)
}
 0x11c   :  { %361 = dma.vmem_to_hbm [thread:$0]  %s359_s4, 128, %s588_s5, [#allocation4]  }
 0x11d   :  { %468 = dma.done.wait [#allocation4], 128  }
 0x11e   :  { %469 = vsyncadd [#allocation4], 4294967168 }
 0x11f   :  { %365 = vsyncpa [#allocation3], 1 }
 0x120   :  { %366 = vsyncpa [#allocation6], 1 }
 0x121   :  { %367 = vsyncpa [#allocation4], 1 }

</bundles_post_ra>
